<compile_context>
chip_gen: v6e
topology: v6e:2x2x1
jax: 0.10.0
libtpu: 0.0.40
codegen_flags: <defaults>
</compile_context>

<pallas_src>
import functools

import jax
import jax.numpy as jnp
from jax.experimental import pallas as pl
from jax.experimental.pallas import tpu as pltpu


def hybrid_fusion_kernel(trans_ref, rf_ref,
                         w1_ref, b1_ref, w2_ref, b2_ref,
                         wa1t_ref, ba1_ref, wa2t_ref, ba2_ref,
                         wf_ref, bf_ref,
                         out_ref, acc_ref, *, inv_seq_len):
    s = pl.program_id(1)

    @pl.when(s == 0)
    def _init():
        acc_ref[...] = jnp.zeros_like(acc_ref)

    # Streaming sum-pool over this sequence tile.  Input is streamed in its
    # native dtype; accumulation is f32 in VMEM scratch.  (If an upstream bf16
    # producer is fused in, an MXU ones-contraction is the preferred pooling
    # path; for the f32 stream used here the plain reduce is already native.)
    # The 1/S scale is applied once in the finalize step, not per tile.
    acc_ref[...] += jnp.sum(trans_ref[...], axis=1, dtype=jnp.float32)

    @pl.when(s == pl.num_programs(1) - 1)
    def _finalize():
        pooled = acc_ref[...] * inv_seq_len                          # [TB, D]

        # trans_adjust: Linear(D, D//2) -> ReLU -> Dropout(id) -> Linear(D//2, C)
        h = jnp.dot(pooled, w1_ref[...],
                    preferred_element_type=jnp.float32) + b1_ref[...]
        h = jnp.maximum(h, 0.0)
        # TODO(synk): Dropout(p=0.2) skipped (eval-mode identity).
        t = jnp.dot(h, w2_ref[...],
                    preferred_element_type=jnp.float32) + b2_ref[...]   # [TB, C]

        # attention gate: Linear(C, C//2) -> ReLU -> Linear(C//2, 1) -> sigmoid.
        # K, N <= C//2 (tiny) => computed on VPU/XLU (broadcast-mul + lane-sum)
        # instead of padded 128-lane MXU matmuls.  wa1t is [A, C] (pre-
        # transposed), wa2t is [1, A].  Only valid while C stays small.
        wa1t = wa1t_ref[...]
        num_a = wa1t.shape[0]
        a_cols = [jnp.sum(t * wa1t[j:j + 1, :], axis=-1, keepdims=True)
                  for j in range(num_a)]
        a = jnp.concatenate(a_cols, axis=-1) + ba1_ref[...]          # [TB, A]
        a = jnp.maximum(a, 0.0)
        logit = jnp.sum(a * wa2t_ref[...], axis=-1,
                        keepdims=True) + ba2_ref[...]                # [TB, 1]
        alpha = jax.nn.sigmoid(logit)

        # fused = concat([alpha*t, (1-alpha)*rf]); Dropout(id); fc as ONE merged
        # matmul with wf stacked to [2C, C].
        fused = jnp.concatenate(
            [alpha * t, (1.0 - alpha) * rf_ref[...]], axis=-1)       # [TB, 2C]
        # TODO(synk): Dropout(p=0.2) on `fused` skipped (eval-mode identity).
        out = jnp.dot(fused, wf_ref[...],
                      preferred_element_type=jnp.float32) + bf_ref[...]
        out_ref[...] = out.astype(out_ref.dtype)


def _tile_candidates(n, unit):
    """Divisors of n that are multiples of `unit` (plus n itself), descending."""
    cands = {d for d in range(1, n + 1) if n % d == 0 and d % unit == 0}
    cands.add(n)
    return sorted(cands, reverse=True)


def _vmem_capacity_bytes():
    try:
        return int(pltpu.get_tpu_info().vmem_capacity_bytes)
    except Exception:
        return 64 << 20   # v7x floor; conservative on v5e/v6e (128 MiB).


def _pick_tiles(B, S, D, itemsize, budget_bytes):
    """Largest (tb, ts) whose double-buffered trans tile fits budget_bytes.

    ts (seq tile) is the bigger lever -> maximize it first (ideally ts == S,
    never below 16); within a ts, pick the largest tb (multiple of 8),
    preferring B//tb >= 2 so the 'parallel' B axis can shard across v7x's
    two TensorCores.
    """
    ts_cands = _tile_candidates(S, 16)
    tb_all = _tile_candidates(B, 8)
    tb_pref = [t for t in tb_all if B // t >= 2] or tb_all
    for ts in ts_cands:
        for tb in tb_pref:
            if 2 * tb * ts * D * itemsize <= budget_bytes:
                return tb, ts
    return tb_pref[-1], ts_cands[-1]


def hybrid_model_forward(trans_hidden, rf_prob, params, *, tb=None, ts=None):
    """trans_hidden: [B, S, D], rf_prob: [B, C] f32 -> [B, C] f32."""
    B, S, D = trans_hidden.shape
    C = rf_prob.shape[1]
    itemsize = jnp.dtype(trans_hidden.dtype).itemsize

    vmem_phys = _vmem_capacity_bytes()
    if tb is None or ts is None:
        auto_tb, auto_ts = _pick_tiles(B, S, D, itemsize, int(vmem_phys * 0.55))
        tb = auto_tb if tb is None else tb
        ts = auto_ts if ts is None else ts
    assert B % tb == 0 and S % ts == 0, "tile sizes must divide (B, S)"

    grid = (B // tb, S // ts)

    weight_names = ["w1", "b1", "w2", "b2",
                    "wa1_t", "ba1", "wa2_t", "ba2",
                    "wf", "bf"]
    weights = [params[n] for n in weight_names]

    def resident(shape):
        # Full-array block with a constant index_map: DMA'd once, VMEM-resident
        # across all grid steps.
        nd = len(shape)
        return pl.BlockSpec(shape, lambda b, s, _nd=nd: (0,) * _nd)

    # VMEM bookkeeping so the scoped limit matches the chosen tiles:
    # double-buffered trans/rf/out blocks + (double-buffered) weights + acc.
    trans_buf = 2 * tb * ts * D * itemsize
    small_bufs = 2 * (2 * tb * C * 4) + tb * D * 4
    weight_bytes = 2 * sum(int(w.size) * jnp.dtype(w.dtype).itemsize
                           for w in weights)
    needed = trans_buf + small_bufs + weight_bytes
    vmem_limit = int(min(max(needed + (8 << 20), 32 << 20),
                         int(vmem_phys * 0.9)))

    H, A = D // 2, C // 2
    cost = pl.CostEstimate(
        flops=int(B * S * D                                   # streaming pool
                  + 2 * B * (D * H + H * C                    # trans_adjust
                             + C * A + A                      # attention gate
                             + 2 * C * C)),                   # merged fc
        transcendentals=int(B),                               # sigmoid
        bytes_accessed=int(trans_hidden.size * itemsize
                           + rf_prob.size * 4
                           + sum(int(w.size) * jnp.dtype(w.dtype).itemsize
                                 for w in weights)
                           + B * C * 4),
    )

    kernel = functools.partial(hybrid_fusion_kernel, inv_seq_len=1.0 / S)

    return pl.pallas_call(
        kernel,
        out_shape=jax.ShapeDtypeStruct((B, C), jnp.float32),
        grid_spec=pltpu.PrefetchScalarGridSpec(
            num_scalar_prefetch=0,
            grid=grid,
            in_specs=[pl.BlockSpec((tb, ts, D), lambda b, s: (b, s, 0)),
                      pl.BlockSpec((tb, C), lambda b, s: (b, 0))]
                     + [resident(w.shape) for w in weights],
            out_specs=pl.BlockSpec((tb, C), lambda b, s: (b, 0)),
            scratch_shapes=[pltpu.VMEM((tb, D), jnp.float32)],
        ),
        compiler_params=pltpu.CompilerParams(
            dimension_semantics=("parallel", "arbitrary"),
            vmem_limit_bytes=vmem_limit),
        cost_estimate=cost,
    )(trans_hidden, rf_prob, *weights)


def init_params(key, trans_dim, num_classes):
    D, C = trans_dim, num_classes
    H = D // 2
    A = C // 2
    ks = jax.random.split(key, 10)
    scale = 0.02
    return {
        # trans_adjust
        "w1": scale * jax.random.normal(ks[0], (D, H), jnp.float32),
        "b1": scale * jax.random.normal(ks[1], (1, H), jnp.float32),
        "w2": scale * jax.random.normal(ks[2], (H, C), jnp.float32),
        "b2": scale * jax.random.normal(ks[3], (1, C), jnp.float32),
        # attention (stored pre-transposed for VPU row-broadcast use)
        "wa1_t": scale * jax.random.normal(ks[4], (A, C), jnp.float32),  # = wa1.T
        "ba1": scale * jax.random.normal(ks[5], (1, A), jnp.float32),
        "wa2_t": scale * jax.random.normal(ks[6], (1, A), jnp.float32),  # = wa2.T
        "ba2": scale * jax.random.normal(ks[7], (1, 1), jnp.float32),
        # fc on concat([alpha*t, (1-alpha)*rf]) as one stacked [2C, C] weight
        "wf": scale * jax.random.normal(ks[8], (2 * C, C), jnp.float32),
        "bf": scale * jax.random.normal(ks[9], (1, C), jnp.float32),
    }


def reference_forward(trans_hidden, rf_prob, p):
    pooled = jnp.mean(trans_hidden, axis=1)
    h = jnp.maximum(pooled @ p["w1"] + p["b1"], 0.0)
    t = h @ p["w2"] + p["b2"]
    a = jnp.maximum(t @ p["wa1_t"].T + p["ba1"], 0.0)
    alpha = jax.nn.sigmoid(a @ p["wa2_t"].T + p["ba2"])
    fused = jnp.concatenate([alpha * t, (1.0 - alpha) * rf_prob], axis=-1)
    return fused @ p["wf"] + p["bf"]


if __name__ == "__main__":
    # Small shapes consistent with the module's forward.
    B, S, trans_dim, num_classes = 16, 64, 128, 8

    key = jax.random.PRNGKey(0)
    k_x, k_rf, k_p = jax.random.split(key, 3)

    # TODO(synk): BERT transformer not translatable; its last_hidden_state is
    # synthesized here as the kernel's input.
    trans_hidden = jax.random.normal(k_x, (B, S, trans_dim), jnp.float32)
    # TODO(synk): sklearn RandomForest predict_proba not translatable; a
    # row-normalized probability matrix stands in for it.
    rf_prob = jax.nn.softmax(
        jax.random.normal(k_rf, (B, num_classes), jnp.float32), axis=-1)

    params = init_params(k_p, trans_dim, num_classes)
    ref = reference_forward(trans_hidden, rf_prob, params)

    # Default (auto-picked, performance) tiling: ts == S, tb a multiple of 8
    # with >= 2 B-grid steps.
    out = jax.block_until_ready(hybrid_model_forward(trans_hidden, rf_prob, params))
    assert out.shape == (B, num_classes)
    assert jnp.allclose(out, ref, atol=1e-4, rtol=1e-4), (
        float(jnp.max(jnp.abs(out - ref))))

    # Explicit smaller seq tile: exercises the multi-step streaming accumulator
    # (init / accumulate / finalize across 4 S-grid steps).
    out2 = jax.block_until_ready(
        hybrid_model_forward(trans_hidden, rf_prob, params, tb=8, ts=16))
    assert jnp.allclose(out2, ref, atol=1e-4, rtol=1e-4), (
        float(jnp.max(jnp.abs(out2 - ref))))

    print("KERNEL_OK")
</pallas_src>

<mosaic_0001>
module attributes {stable_mosaic.version = 11 : i64} {
  func.func @hybrid_fusion_kernel(%arg0: i32, %arg1: i32, %arg2: memref<8x64x128xf32, #tpu.memory_space<vmem>>, %arg3: memref<8x8xf32, #tpu.memory_space<vmem>>, %arg4: memref<128x64xf32, #tpu.memory_space<vmem>>, %arg5: memref<1x64xf32, #tpu.memory_space<vmem>>, %arg6: memref<64x8xf32, #tpu.memory_space<vmem>>, %arg7: memref<1x8xf32, #tpu.memory_space<vmem>>, %arg8: memref<4x8xf32, #tpu.memory_space<vmem>>, %arg9: memref<1x4xf32, #tpu.memory_space<vmem>>, %arg10: memref<1x4xf32, #tpu.memory_space<vmem>>, %arg11: memref<1x1xf32, #tpu.memory_space<vmem>>, %arg12: memref<16x8xf32, #tpu.memory_space<vmem>>, %arg13: memref<1x8xf32, #tpu.memory_space<vmem>>, %arg14: memref<8x8xf32, #tpu.memory_space<vmem>>, %arg15: memref<8x128xf32, #tpu.memory_space<vmem>>) attributes {dimension_semantics = [#tpu.dimension_semantics<parallel>, #tpu.dimension_semantics<arbitrary>], iteration_bounds = array<i64: 2, 1>, scalar_prefetch = 0 : i64, scratch_operands = 1 : i64, tpu.core_type = #tpu.core_type<tc>, window_params = [{transform_indices = @transform_0, window_bounds = array<i64: 8, 64, 128>}, {transform_indices = @transform_1, window_bounds = array<i64: 8, 8>}, {pipeline_mode = #tpu.pipeline_mode<synchronous>, transform_indices = @transform_2, window_bounds = array<i64: 128, 64>}, {pipeline_mode = #tpu.pipeline_mode<synchronous>, transform_indices = @transform_3, window_bounds = array<i64: 1, 64>}, {pipeline_mode = #tpu.pipeline_mode<synchronous>, transform_indices = @transform_4, window_bounds = array<i64: 64, 8>}, {pipeline_mode = #tpu.pipeline_mode<synchronous>, transform_indices = @transform_5, window_bounds = array<i64: 1, 8>}, {pipeline_mode = #tpu.pipeline_mode<synchronous>, transform_indices = @transform_6, window_bounds = array<i64: 4, 8>}, {pipeline_mode = #tpu.pipeline_mode<synchronous>, transform_indices = @transform_7, window_bounds = array<i64: 1, 4>}, {pipeline_mode = #tpu.pipeline_mode<synchronous>, transform_indices = @transform_8, window_bounds = array<i64: 1, 4>}, {pipeline_mode = #tpu.pipeline_mode<synchronous>, transform_indices = @transform_9, window_bounds = array<i64: 1, 1>}, {pipeline_mode = #tpu.pipeline_mode<synchronous>, transform_indices = @transform_10, window_bounds = array<i64: 16, 8>}, {pipeline_mode = #tpu.pipeline_mode<synchronous>, transform_indices = @transform_11, window_bounds = array<i64: 1, 8>}, {transform_indices = @transform_12, window_bounds = array<i64: 8, 8>}]} {
    %c0_i32 = arith.constant 0 : i32
    %0 = arith.cmpi eq, %arg1, %c0_i32 : i32
    %1 = arith.extui %0 : i1 to i32
    %c0_i32_0 = arith.constant 0 : i32
    %2 = arith.cmpi ne, %1, %c0_i32_0 : i32
    scf.if %2 {
      %cst_9 = arith.constant 0.000000e+00 : f32
      %11 = vector.broadcast %cst_9 : f32 to vector<8x128xf32>
      %c0_10 = arith.constant 0 : index
      %c0_11 = arith.constant 0 : index
      %12 = vector.load %arg15[%c0_10, %c0_11] : memref<8x128xf32, #tpu.memory_space<vmem>>, vector<8x128xf32>
      tpu.vector_store %arg15[%c0_10, %c0_11], %11 {strides = array<i32>} : memref<8x128xf32, #tpu.memory_space<vmem>>, vector<8x128xf32>,
    } else {
    }
    %c0 = arith.constant 0 : index
    %c0_1 = arith.constant 0 : index
    %3 = vector.load %arg15[%c0, %c0_1] : memref<8x128xf32, #tpu.memory_space<vmem>>, vector<8x128xf32>
    %c0_2 = arith.constant 0 : index
    %c0_3 = arith.constant 0 : index
    %c0_4 = arith.constant 0 : index
    %4 = vector.load %arg2[%c0_2, %c0_3, %c0_4] : memref<8x64x128xf32, #tpu.memory_space<vmem>>, vector<8x64x128xf32>
    %cst = arith.constant dense<0.000000e+00> : vector<8x128xf32>
    %5 = vector.multi_reduction <add>, %4, %cst [1] : vector<8x64x128xf32> to vector<8x128xf32>
    %6 = arith.addf %3, %5 : vector<8x128xf32>
    %c0_5 = arith.constant 0 : index
    %c0_6 = arith.constant 0 : index
    %7 = vector.load %arg15[%c0_5, %c0_6] : memref<8x128xf32, #tpu.memory_space<vmem>>, vector<8x128xf32>
    tpu.vector_store %arg15[%c0_5, %c0_6], %6 {strides = array<i32>} : memref<8x128xf32, #tpu.memory_space<vmem>>, vector<8x128xf32>,
    %c0_i32_7 = arith.constant 0 : i32
    %8 = arith.cmpi eq, %arg1, %c0_i32_7 : i32
    %9 = arith.extui %8 : i1 to i32
    %c0_i32_8 = arith.constant 0 : i32
    %10 = arith.cmpi ne, %9, %c0_i32_8 : i32
    scf.if %10 {
      %c0_9 = arith.constant 0 : index
      %c0_10 = arith.constant 0 : index
      %11 = vector.load %arg15[%c0_9, %c0_10] : memref<8x128xf32, #tpu.memory_space<vmem>>, vector<8x128xf32>
      %cst_11 = arith.constant 1.562500e-02 : f32
      %12 = vector.broadcast %cst_11 : f32 to vector<8x128xf32>
      %13 = arith.mulf %11, %12 : vector<8x128xf32>
      %c0_12 = arith.constant 0 : index
      %c0_13 = arith.constant 0 : index
      %14 = vector.load %arg4[%c0_12, %c0_13] : memref<128x64xf32, #tpu.memory_space<vmem>>, vector<128x64xf32>
      %cst_14 = arith.constant dense<0.000000e+00> : vector<8x64xf32>
      %15 = tpu.matmul %13, %14, %cst_14 {dimension_numbers = #tpu.dot_dimension_numbers<[1], [0], [0], [1], [0, 0, 1, 1], [], []>} : vector<8x128xf32>, vector<128x64xf32>, vector<8x64xf32> -> vector<8x64xf32>
      %c0_15 = arith.constant 0 : index
      %c0_16 = arith.constant 0 : index
      %16 = vector.load %arg5[%c0_15, %c0_16] : memref<1x64xf32, #tpu.memory_space<vmem>>, vector<1x64xf32>
      %17 = vector.broadcast %16 : vector<1x64xf32> to vector<8x64xf32>
      %18 = arith.addf %15, %17 : vector<8x64xf32>
      %cst_17 = arith.constant 0.000000e+00 : f32
      %19 = vector.broadcast %cst_17 : f32 to vector<8x64xf32>
      %20 = arith.maximumf %18, %19 : vector<8x64xf32>
      %c0_18 = arith.constant 0 : index
      %c0_19 = arith.constant 0 : index
      %21 = vector.load %arg6[%c0_18, %c0_19] : memref<64x8xf32, #tpu.memory_space<vmem>>, vector<64x8xf32>
      %cst_20 = arith.constant dense<0.000000e+00> : vector<8x8xf32>
      %22 = tpu.matmul %20, %21, %cst_20 {dimension_numbers = #tpu.dot_dimension_numbers<[1], [0], [0], [1], [0, 0, 1, 1], [], []>} : vector<8x64xf32>, vector<64x8xf32>, vector<8x8xf32> -> vector<8x8xf32>
      %c0_21 = arith.constant 0 : index
      %c0_22 = arith.constant 0 : index
      %23 = vector.load %arg7[%c0_21, %c0_22] : memref<1x8xf32, #tpu.memory_space<vmem>>, vector<1x8xf32>
      %24 = vector.broadcast %23 : vector<1x8xf32> to vector<8x8xf32>
      %25 = arith.addf %22, %24 : vector<8x8xf32>
      %c0_23 = arith.constant 0 : index
      %c0_24 = arith.constant 0 : index
      %26 = vector.load %arg8[%c0_23, %c0_24] : memref<4x8xf32, #tpu.memory_space<vmem>>, vector<4x8xf32>
      %27 = vector.extract_strided_slice %26 {offsets = [0, 0], sizes = [1, 8], strides = [1, 1]} : vector<4x8xf32> to vector<1x8xf32>
      %28 = vector.broadcast %27 : vector<1x8xf32> to vector<8x8xf32>
      %29 = arith.mulf %25, %28 : vector<8x8xf32>
      %cst_25 = arith.constant dense<0.000000e+00> : vector<8xf32>
      %30 = vector.multi_reduction <add>, %29, %cst_25 [1] : vector<8x8xf32> to vector<8xf32>
      %31 = vector.shape_cast %30 : vector<8xf32> to vector<8x1xf32>
      %32 = vector.extract_strided_slice %26 {offsets = [1, 0], sizes = [1, 8], strides = [1, 1]} : vector<4x8xf32> to vector<1x8xf32>
      %33 = vector.broadcast %32 : vector<1x8xf32> to vector<8x8xf32>
      %34 = arith.mulf %25, %33 : vector<8x8xf32>
      %cst_26 = arith.constant dense<0.000000e+00> : vector<8xf32>
      %35 = vector.multi_reduction <add>, %34, %cst_26 [1] : vector<8x8xf32> to vector<8xf32>
      %36 = vector.shape_cast %35 : vector<8xf32> to vector<8x1xf32>
      %37 = vector.extract_strided_slice %26 {offsets = [2, 0], sizes = [1, 8], strides = [1, 1]} : vector<4x8xf32> to vector<1x8xf32>
      %38 = vector.broadcast %37 : vector<1x8xf32> to vector<8x8xf32>
      %39 = arith.mulf %25, %38 : vector<8x8xf32>
      %cst_27 = arith.constant dense<0.000000e+00> : vector<8xf32>
      %40 = vector.multi_reduction <add>, %39, %cst_27 [1] : vector<8x8xf32> to vector<8xf32>
      %41 = vector.shape_cast %40 : vector<8xf32> to vector<8x1xf32>
      %42 = vector.extract_strided_slice %26 {offsets = [3, 0], sizes = [1, 8], strides = [1, 1]} : vector<4x8xf32> to vector<1x8xf32>
      %43 = vector.broadcast %42 : vector<1x8xf32> to vector<8x8xf32>
      %44 = arith.mulf %25, %43 : vector<8x8xf32>
      %cst_28 = arith.constant dense<0.000000e+00> : vector<8xf32>
      %45 = vector.multi_reduction <add>, %44, %cst_28 [1] : vector<8x8xf32> to vector<8xf32>
      %46 = vector.shape_cast %45 : vector<8xf32> to vector<8x1xf32>
      %47 = tpu.concatenate %31, %36, %41, %46 in 1 : vector<8x1xf32>, vector<8x1xf32>, vector<8x1xf32>, vector<8x1xf32> -> vector<8x4xf32>
      %c0_29 = arith.constant 0 : index
      %c0_30 = arith.constant 0 : index
      %48 = vector.load %arg9[%c0_29, %c0_30] : memref<1x4xf32, #tpu.memory_space<vmem>>, vector<1x4xf32>
      %49 = vector.broadcast %48 : vector<1x4xf32> to vector<8x4xf32>
      %50 = arith.addf %47, %49 : vector<8x4xf32>
      %cst_31 = arith.constant 0.000000e+00 : f32
      %51 = vector.broadcast %cst_31 : f32 to vector<8x4xf32>
      %52 = arith.maximumf %50, %51 : vector<8x4xf32>
      %c0_32 = arith.constant 0 : index
      %c0_33 = arith.constant 0 : index
      %53 = vector.load %arg10[%c0_32, %c0_33] : memref<1x4xf32, #tpu.memory_space<vmem>>, vector<1x4xf32>
      %54 = vector.broadcast %53 : vector<1x4xf32> to vector<8x4xf32>
      %55 = arith.mulf %52, %54 : vector<8x4xf32>
      %cst_34 = arith.constant dense<0.000000e+00> : vector<8xf32>
      %56 = vector.multi_reduction <add>, %55, %cst_34 [1] : vector<8x4xf32> to vector<8xf32>
      %57 = vector.shape_cast %56 : vector<8xf32> to vector<8x1xf32>
      %c0_35 = arith.constant 0 : index
      %c0_36 = arith.constant 0 : index
      %58 = vector.load %arg11[%c0_35, %c0_36] : memref<1x1xf32, #tpu.memory_space<vmem>>, vector<1x1xf32>
      %59 = vector.broadcast %58 : vector<1x1xf32> to vector<8x1xf32>
      %60 = arith.addf %57, %59 : vector<8x1xf32>
      %61 = arith.negf %60 : vector<8x1xf32>
      %62 = math.exp %61 : vector<8x1xf32>
      %cst_37 = arith.constant 1.000000e+00 : f32
      %63 = vector.broadcast %cst_37 : f32 to vector<8x1xf32>
      %64 = arith.addf %63, %62 : vector<8x1xf32>
      %65 = arith.divf %63, %64 : vector<8x1xf32>
      %66 = vector.broadcast %65 : vector<8x1xf32> to vector<8x8xf32>
      %67 = arith.mulf %66, %25 : vector<8x8xf32>
      %cst_38 = arith.constant 1.000000e+00 : f32
      %68 = vector.broadcast %cst_38 : f32 to vector<8x1xf32>
      %69 = arith.subf %68, %65 : vector<8x1xf32>
      %c0_39 = arith.constant 0 : index
      %c0_40 = arith.constant 0 : index
      %70 = vector.load %arg3[%c0_39, %c0_40] : memref<8x8xf32, #tpu.memory_space<vmem>>, vector<8x8xf32>
      %71 = vector.broadcast %69 : vector<8x1xf32> to vector<8x8xf32>
      %72 = arith.mulf %71, %70 : vector<8x8xf32>
      %73 = tpu.concatenate %67, %72 in 1 : vector<8x8xf32>, vector<8x8xf32> -> vector<8x16xf32>
      %c0_41 = arith.constant 0 : index
      %c0_42 = arith.constant 0 : index
      %74 = vector.load %arg12[%c0_41, %c0_42] : memref<16x8xf32, #tpu.memory_space<vmem>>, vector<16x8xf32>
      %cst_43 = arith.constant dense<0.000000e+00> : vector<8x8xf32>
      %75 = tpu.matmul %73, %74, %cst_43 {dimension_numbers = #tpu.dot_dimension_numbers<[1], [0], [0], [1], [0, 0, 1, 1], [], []>} : vector<8x16xf32>, vector<16x8xf32>, vector<8x8xf32> -> vector<8x8xf32>
      %c0_44 = arith.constant 0 : index
      %c0_45 = arith.constant 0 : index
      %76 = vector.load %arg13[%c0_44, %c0_45] : memref<1x8xf32, #tpu.memory_space<vmem>>, vector<1x8xf32>
      %77 = vector.broadcast %76 : vector<1x8xf32> to vector<8x8xf32>
      %78 = arith.addf %75, %77 : vector<8x8xf32>
      %c0_46 = arith.constant 0 : index
      %c0_47 = arith.constant 0 : index
      %79 = vector.load %arg14[%c0_46, %c0_47] : memref<8x8xf32, #tpu.memory_space<vmem>>, vector<8x8xf32>
      tpu.vector_store %arg14[%c0_46, %c0_47], %78 {strides = array<i32>} : memref<8x8xf32, #tpu.memory_space<vmem>>, vector<8x8xf32>,
    } else {
    }
    return
  }
  func.func @transform_0(%arg0: i32, %arg1: i32) -> (i32, i32, i32) {
    %c0_i32 = arith.constant 0 : i32
    %c0_i32_0 = arith.constant 0 : i32
    return %arg0, %arg1, %c0_i32 : i32, i32, i32
  }
  func.func @transform_1(%arg0: i32, %arg1: i32) -> (i32, i32) {
    %c0_i32 = arith.constant 0 : i32
    %c0_i32_0 = arith.constant 0 : i32
    return %arg0, %c0_i32 : i32, i32
  }
  func.func @transform_2(%arg0: i32, %arg1: i32) -> (i32, i32) {
    %c0_i32 = arith.constant 0 : i32
    %c0_i32_0 = arith.constant 0 : i32
    %c0_i32_1 = arith.constant 0 : i32
    return %c0_i32, %c0_i32_0 : i32, i32
  }
  func.func @transform_3(%arg0: i32, %arg1: i32) -> (i32, i32) {
    %c0_i32 = arith.constant 0 : i32
    %c0_i32_0 = arith.constant 0 : i32
    %c0_i32_1 = arith.constant 0 : i32
    return %c0_i32, %c0_i32_0 : i32, i32
  }
  func.func @transform_4(%arg0: i32, %arg1: i32) -> (i32, i32) {
    %c0_i32 = arith.constant 0 : i32
    %c0_i32_0 = arith.constant 0 : i32
    %c0_i32_1 = arith.constant 0 : i32
    return %c0_i32, %c0_i32_0 : i32, i32
  }
  func.func @transform_5(%arg0: i32, %arg1: i32) -> (i32, i32) {
    %c0_i32 = arith.constant 0 : i32
    %c0_i32_0 = arith.constant 0 : i32
    %c0_i32_1 = arith.constant 0 : i32
    return %c0_i32, %c0_i32_0 : i32, i32
  }
  func.func @transform_6(%arg0: i32, %arg1: i32) -> (i32, i32) {
    %c0_i32 = arith.constant 0 : i32
    %c0_i32_0 = arith.constant 0 : i32
    %c0_i32_1 = arith.constant 0 : i32
    return %c0_i32, %c0_i32_0 : i32, i32
  }
  func.func @transform_7(%arg0: i32, %arg1: i32) -> (i32, i32) {
    %c0_i32 = arith.constant 0 : i32
    %c0_i32_0 = arith.constant 0 : i32
    %c0_i32_1 = arith.constant 0 : i32
    return %c0_i32, %c0_i32_0 : i32, i32
  }
  func.func @transform_8(%arg0: i32, %arg1: i32) -> (i32, i32) {
    %c0_i32 = arith.constant 0 : i32
    %c0_i32_0 = arith.constant 0 : i32
    %c0_i32_1 = arith.constant 0 : i32
    return %c0_i32, %c0_i32_0 : i32, i32
  }
  func.func @transform_9(%arg0: i32, %arg1: i32) -> (i32, i32) {
    %c0_i32 = arith.constant 0 : i32
    %c0_i32_0 = arith.constant 0 : i32
    %c0_i32_1 = arith.constant 0 : i32
    return %c0_i32, %c0_i32_0 : i32, i32
  }
  func.func @transform_10(%arg0: i32, %arg1: i32) -> (i32, i32) {
    %c0_i32 = arith.constant 0 : i32
    %c0_i32_0 = arith.constant 0 : i32
    %c0_i32_1 = arith.constant 0 : i32
    return %c0_i32, %c0_i32_0 : i32, i32
  }
  func.func @transform_11(%arg0: i32, %arg1: i32) -> (i32, i32) {
    %c0_i32 = arith.constant 0 : i32
    %c0_i32_0 = arith.constant 0 : i32
    %c0_i32_1 = arith.constant 0 : i32
    return %c0_i32, %c0_i32_0 : i32, i32
  }
  func.func @transform_12(%arg0: i32, %arg1: i32) -> (i32, i32) {
    %c0_i32 = arith.constant 0 : i32
    %c0_i32_0 = arith.constant 0 : i32
    return %arg0, %c0_i32 : i32, i32
  }
}

</mosaic_0001>

<bundles_post_ra>
// kernel: tpu_custom_call.1
= control target key start
LH: loop header
LB: loop body
LE: loop exit
PB: predicated region body
PF: predicated region fallthrough
CT: control target
= control target key end

     0   :  { %s1768_s0 = inlined_call_operand.hbm [shape: f32[16,64,128], index: 0, kind: input, shape index: {}]   ;;  %s1769_s1 = inlined_call_operand.vmem [shape: f32[16,8], index: 1, kind: input, shape index: {}]   ;;  %s1770_s2 = inlined_call_operand.vmem [shape: f32[128,64], index: 2, kind: input, shape index: {}]   ;;  %s1771_s3 = inlined_call_operand.vmem [shape: f32[1,64], index: 3, kind: input, shape index: {}]   ;;  %s1772_s4 = inlined_call_operand.vmem [shape: f32[64,8], index: 4, kind: input, shape index: {}]   ;;  %s1773_s5 = inlined_call_operand.vmem [shape: f32[1,8], index: 5, kind: input, shape index: {}]   ;;  %s1774_s6 = inlined_call_operand.vmem [shape: f32[4,8], index: 6, kind: input, shape index: {}]   ;;  %s1775_s7 = inlined_call_operand.vmem [shape: f32[1,4], index: 7, kind: input, shape index: {}]   ;;  %s1776_s8 = inlined_call_operand.vmem [shape: f32[1,4], index: 8, kind: input, shape index: {}]   ;;  %s1777_s9 = inlined_call_operand.<no memory space> [shape: f32[1,1], index: 9, kind: input, shape index: {}]   ;;  %s1778_s10 = inlined_call_operand.vmem [shape: f32[16,8], index: 10, kind: input, shape index: {}]   ;;  %s1779_s11 = inlined_call_operand.vmem [shape: f32[1,8], index: 11, kind: input, shape index: {}]   ;;  %s1780_s12 = inlined_call_operand.vmem [shape: f32[16,8], index: 12, kind: output, shape index: {}]  }
   0x1   :  { %1782 = sst [smem:[#allocation8_spill]] %s1779_s11  ;;  %v17_v0 = vstv %s1777_s9 }
   0x2   :  { %1783 = sst [smem:[#allocation9_spill]] %s1780_s12  ;;  %18 = vst [vmem:[#allocation3] sm:$0x1] %v17_v0 }
   0x3   :  { %19 = vsyncpa [#allocation5], 0 }
   0x4   :  { %21 = vsyncpa [#allocation5 + $0x1], 0  ;;  %s1460_s23 = smov 0   ;;  %s1462_s24 = smov 0  }
   0x5   :  { %s1464_s25 = smov 0   ;;  %s1466_s26 = smov 0  }
   0x6   :  { %s1468_s27 = smov 0   ;;  %s1470_s28 = smov 0  }
   0x7 LB: > { %s1123_s9 = sadd.s32 4294967295, %s1383_s28   ;;  %s39_s29 = sadd.s32 1, %s1379_s27  ;;  %s1383_s28 = sphi %s1470_s28, %s27_s28   ;;  %s1379_s27 = sphi %s1468_s27, %s1795_s27   ;;  %s1375_s26 = sphi %s1466_s26, %s1794_s26   ;;  %s1371_s25 = sphi %s1464_s25, %s1793_s25   ;;  %s1367_s24 = sphi %s1462_s24, %s1792_s24   ;;  %s1363_s23 = sphi %s1460_s23, %s1791_s23  }
   0x8   : > { %p41_p0 = scmp.ge.s32.totalorder %s39_s29, 2  ;;  %s48_s30 = sadd.s32 1, %s1371_s25 }
   0x9   : > { %p55_p1 = scmp.ne.s32.totalorder %s1371_s25, %s1367_s24  ;;  %p56_p2 = scmp.eq.s32.totalorder %s1383_s28, 0 }
   0xa   : > { %s1797_s29 = smov (%p41_p0, %s39_s29), 0  ;;  %p61_p4 = scmp.ne.s32.totalorder %s1367_s24, %s1363_s23 }
   0xb   : > { %1784 = sst [smem:[#allocation7_spill]] %s1797_s29  ;;  %p1496_p3 = por %p56_p2, %p55_p1 }
   0xc   : > { %s43_s14 = ssub.s32 %s1379_s27, %s1797_s29  ;;  %p62_p5 = scmp.eq.s32.totalorder %s1123_s9, 0 }
   0xd   : > { %p46_p6 = scmp.eq.s32.totalorder %s43_s14, 0  ;;  %p1244_p8 = scmp.lt.s32.totalorder %s1383_s28, 2 }
   0xe   : > { %p1503_p7 = por %p62_p5, %p61_p4  ;;  %s377_s17 = sand.u32 1, %s1371_s25  }
   0xf   : > { %s1509_s16 = scalar_select %p46_p6, %s1371_s25, %s48_s30  }
  0x10   : > { %s1147_s18 = sshll.u32 %s1379_s27, 13  ;;  %s1127_s19 = sshll.u32 %s377_s17, 9 }
  0x11   : > { %s390_s22 = scalar_lea.hbm %s1768_s0, %s1147_s18  ;;  %s381_s12 = scalar_lea.vmem [#allocation4], %s1127_s19 }
  0x12   : > { %s391_s11 = sshll.u32 %s381_s12, 4  ;;  %p1518_p9 = pnand %p1244_p8, %p1496_p3  ;;  %s392_s11 = int_to_ptr.vmem [resolvable:$true] %s391_s11 }
  0x13   : > { %s378_s9 = scalar_lea.sflag [#allocation5], %s377_s17  ;;  %s1318_s30 = scalar_lea.vmem %s392_s11, 8192 }
  0x14   : > { %p1307_p10 = pneg %p1518_p9  ;;  %p1319_p11 = scmp.ne.s32.totalorder %s392_s11, %s1318_s30 }
  0x15   : > { %s1385_s14 = smov [#allocation4]  }
  0x16   : > { %p1321_p12 = pnand %p1319_p11, %p1307_p10  ;;  %s1323_s29 = sshll.u32 %s1385_s14, 4  ;;  %s1324_s29 = int_to_ptr.vmem [resolvable:$false] %s1323_s29 }
  0x17   : > { %s1325_s18 = scalar_lea.vmem %s1324_s29, 16384  ;;  %p1326_p0 = scmp.lt.s32.totalorder %s392_s11, %s1324_s29 }
  0x18   : > { %p1322_p13 = pneg %p1321_p12  ;;  %p1327_p1 = scmp.lt.s32.totalorder %s1325_s18, %s1318_s30 }
  0x1a   : > { %p1328_p2 = por %p1327_p1, %p1326_p0 }
  0x1c   : > { %p1329_p3 = pnand %p1328_p2, %p1322_p13 }
  0x1e   : > { %1332 = shalt.err (!%p1329_p3)
}
  0x1f   : > { %s1386_s12 = smov 128   ;;  %s1387_s13 = smov 8  }
  0x20   : > { %1243 = dma.hbm_to_vmem [thread:$0]  (!%p1518_p9), %s390_s22, 8192, %s392_s11, %s378_s9, %s1386_s12, %s1386_s12, %s1387_s13  }
  0x21   : > { %p1131_p4 = scmp.ge.s32.totalorder %s1383_s28, 1  ;;  %p406_p5 = scmp.lt.s32.totalorder %s1383_s28, 3 }
  0x23   : > { %p407_p6 = pnand %p1131_p4, %p406_p5 }
  0x24   : > { %s412_s17 = sand.u32 (!%p407_p6), 1, %s1367_s24  }
  0x25   : > { %410 = sbr.rel (%p407_p6) target bundleno = 1254 (0x4e6), region = 68  ;;  %s1132_s19 = sshll.u32 (!%p407_p6), %s412_s17, 9 }
  0x26   : > { %s413_s29 = scalar_lea.sflag (!%p407_p6), [#allocation5], %s412_s17  ;;  %s1529_s20 = scalar_lea.vmem (!%p407_p6), [#allocation4], %s1132_s19 }
  0x2a   : > { %1358 = dma.done.wait (%p1503_p7), %s413_s29, 8192  }
  0x2b   : > { %1360 = vsyncadd (%p1503_p7), %s413_s29, 4294959104  ;;  %v1388_v1 = vmov 0.0   ;;  %vm1389_vm0 = vmmov 0   ;;  %v689_v2 = vld [vmem:[%s1770_s2 + $0x78] sm:$0xff]  ;;  %v688_v3 = vld [vmem:[%s1770_s2 + $0x70] sm:$0xff]  ;;  %vm652_vm1 = vcmask 1041409  }
  0x2c   : > { %1177 = vmatprep.subr.mxu0 %v1388_v1  ;;  %1209 = vmatprep.mubr.msk.f32.mxu0 %vm1389_vm0, %v1388_v1  ;;  %v687_v4 = vld [vmem:[%s1770_s2 + $0x68] sm:$0xff]  ;;  %v686_v5 = vld [vmem:[%s1770_s2 + $0x60] sm:$0xff]  ;;  %v685_v8 = vld [vmem:[%s1770_s2 + $0x58] sm:$0xff]  ;;  %vm654_vm2 = vcmask 1042434   ;;  %vm656_vm3 = vcmask 1043459   ;;  %vm658_vm4 = vcmask 1044484  }
  0x2d   : > { %1212 = vmatprep.subr.mxu1 %v1388_v1  ;;  %1228 = vmatprep.mubr.msk.f32.mxu1 %vm1389_vm0, %v1388_v1  ;;  %v476_v6 = vld [vmem:[%s1529_s20] sm:$0xff]  ;;  %v477_v7 = vld [vmem:[%s1529_s20 + $0x8] sm:$0xff]  ;;  %v478_v9 = vld [vmem:[%s1529_s20 + $0x10] sm:$0xff]  ;;  %vm660_vm5 = vcmask 1045509   ;;  %vm662_vm6 = vcmask 1046534   ;;  %vm664_vm7 = vcmask 1047559  }
  0x2e   : > { %1178 = vmatpush3.msra.mxu0 %v689_v2  ;;  %v540_v10 = vadd.f32 %v477_v7, %v476_v6  ;;  %v684_v11 = vld [vmem:[%s1770_s2 + $0x50] sm:$0xff]  ;;  %v479_v12 = vld [vmem:[%s1529_s20 + $0x18] sm:$0xff]  ;;  %v484_v13 = vld [vmem:[%s1529_s20 + $0x40] sm:$0xff]  ;;  %vm783_vm8 = vcmask 523264   ;;  %vm863_vm9 = vcmask 64512   ;;  %vm891_vm10 = vcmask 7168  }
  0x2f   : > { %1179 = vmatprep.subr.mxu0 %v1388_v1  ;;  %v485_v14 = vld [vmem:[%s1529_s20 + $0x48] sm:$0xff]  ;;  %v486_v15 = vld [vmem:[%s1529_s20 + $0x50] sm:$0xff]  ;;  %v480_v18 = vld [vmem:[%s1529_s20 + $0x20] sm:$0xff]  ;;  %vm893_vm11 = vcmask 15360   ;;  %vm895_vm12 = vcmask 23552   ;;  %vm914_vm13 = vcmask 31744  }
  0x30   : > { %1180 = vmatpush3.msra.mxu0 %v688_v3  ;;  %v541_v16 = vadd.f32 %v540_v10, %v478_v9  ;;  %v683_v17 = vld [vmem:[%s1770_s2 + $0x48] sm:$0xff]  ;;  %v553_v19 = vadd.f32 %v485_v14, %v484_v13  ;;  %v682_v20 = vld [vmem:[%s1770_s2 + $0x40] sm:$0xff]  ;;  %v494_v26 = vld [vmem:[%s1529_s20 + $0x90] sm:$0xff]  ;;  %p462_p7 = scmp.lt.s32.totalorder %s1375_s26, 1  ;;  %s1391_s18 = smov 8   ;;  %vm960_vm14 = vcmask 130048  }
  0x31   : > { %1181 = vmatprep.subr.mxu0 %v1388_v1  ;;  %v487_v21 = vld [vmem:[%s1529_s20 + $0x58] sm:$0xff]  ;;  %v492_v22 = vld [vmem:[%s1529_s20 + $0x80] sm:$0xff]  ;;  %v481_v24 = vld [vmem:[%s1529_s20 + $0x28] sm:$0xff]  ;;  %s1789_s29 = sld [smem:[#allocation9_spill]] }
  0x32   : > { %1182 = vmatpush3.msra.mxu0 %v687_v4  ;;  %v542_v23 = vadd.f32 %v541_v16, %v479_v12  ;;  %v493_v25 = vld [vmem:[%s1529_s20 + $0x88] sm:$0xff]  ;;  %v554_v27 = vadd.f32 %v553_v19, %v486_v15  ;;  %v681_v28 = vld [vmem:[%s1770_s2 + $0x38] sm:$0xff]  ;;  %v488_v30 = vld [vmem:[%s1529_s20 + $0x60] sm:$0xff]  ;;  %s1799_s26 = smov (!%p462_p7, %s1375_s26), 1 }
  0x33   : > { %1183 = vmatprep.subr.mxu0 %v1388_v1  ;;  %v482_v29 = vld [vmem:[%s1529_s20 + $0x30] sm:$0xff]  ;;  %v566_v32 = vadd.f32 %v493_v25, %v492_v22  ;;  %v495_v33 = vld [vmem:[%s1529_s20 + $0x98] sm:$0xff]  ;;  %v500_v34 = vld [vmem:[%s1529_s20 + $0xc0] sm:$0xff]  ;;  %s1133_s23 = sshll.u32 %s1799_s26, 3  ;;  %s1788_s26 = sld [smem:[#allocation8_spill]] }
  0x34   : > { %1184 = vmatpush3.msra.mxu0 %v686_v5  ;;  %v543_v31 = vadd.f32 %v542_v23, %v480_v18  ;;  %v501_v35 = vld [vmem:[%s1529_s20 + $0xc8] sm:$0xff]  ;;  %v555_v36 = vadd.f32 %v554_v27, %v487_v21  ;;  %v483_v38 = vld [vmem:[%s1529_s20 + $0x38] sm:$0xff]  ;;  %v502_v40 = vld [vmem:[%s1529_s20 + $0xd0] sm:$0xff]  ;;  %s465_s14 = scalar_lea.vmem %s1769_s1, %s1133_s23 }
  0x35   : > { %1185 = vmatprep.subr.mxu0 %v1388_v1  ;;  %v680_v37 = vld [vmem:[%s1770_s2 + $0x30] sm:$0xff]  ;;  %v567_v42 = vadd.f32 %v566_v32, %v494_v26  ;;  %v579_v43 = vadd.f32 %v501_v35, %v500_v34  ;;  %v496_v45 = vld [vmem:[%s1529_s20 + $0xa0] sm:$0xff]  ;;  %v503_v46 = vld [vmem:[%s1529_s20 + $0xd8] sm:$0xff] }
  0x36   : > { %1186 = vmatpush3.msra.mxu0 %v685_v8  ;;  %v489_v39 = vld [vmem:[%s1529_s20 + $0x68] sm:$0xff]  ;;  %v544_v41 = vadd.f32 %v543_v31, %v481_v24  ;;  %v490_v44 = vld [vmem:[%s1529_s20 + $0x70] sm:$0xff]  ;;  %v556_v47 = vadd.f32 %v555_v36, %v488_v30  ;;  %v508_v49 = vld [vmem:[%s1529_s20 + $0x100] sm:$0xff] }
  0x37   : > { %1187 = vmatprep.subr.mxu0 %v1388_v1  ;;  %v679_v48 = vld [vmem:[%s1770_s2 + $0x28] sm:$0xff]  ;;  %v510_v51 = vld [vmem:[%s1529_s20 + $0x110] sm:$0xff]  ;;  %v568_v53 = vadd.f32 %v567_v42, %v495_v33  ;;  %v580_v54 = vadd.f32 %v579_v43, %v502_v40  ;;  %v491_v55 = vld [vmem:[%s1529_s20 + $0x78] sm:$0xff] }
  0x38   : > { %1188 = vmatpush3.msra.mxu0 %v684_v11  ;;  %v509_v50 = vld [vmem:[%s1529_s20 + $0x108] sm:$0xff]  ;;  %v545_v52 = vadd.f32 %v544_v41, %v482_v29  ;;  %v504_v57 = vld [vmem:[%s1529_s20 + $0xe0] sm:$0xff]  ;;  %v557_v58 = vadd.f32 %v556_v47, %v489_v39  ;;  %v498_v61 = vld [vmem:[%s1529_s20 + $0xb0] sm:$0xff] }
  0x39   : > { %1189 = vmatprep.subr.mxu0 %v1388_v1  ;;  %v497_v56 = vld [vmem:[%s1529_s20 + $0xa8] sm:$0xff]  ;;  %v592_v59 = vadd.f32 %v509_v50, %v508_v49  ;;  %v678_v60 = vld [vmem:[%s1770_s2 + $0x20] sm:$0xff]  ;;  %v569_v2 = vadd.f32 %v568_v53, %v496_v45  ;;  %v581_v3 = vadd.f32 %v580_v54, %v503_v46  ;;  %v518_v6 = vld [vmem:[%s1529_s20 + $0x150] sm:$0xff] }
  0x3a   : > { %1190 = vmatpush3.msra.mxu0 %v683_v17  ;;  %v511_v62 = vld [vmem:[%s1529_s20 + $0x118] sm:$0xff]  ;;  %v516_v63 = vld [vmem:[%s1529_s20 + $0x140] sm:$0xff]  ;;  %v546_v0 = vadd.f32 %v545_v52, %v483_v38  ;;  %v505_v4 = vld [vmem:[%s1529_s20 + $0xe8] sm:$0xff]  ;;  %v558_v7 = vadd.f32 %v557_v58, %v490_v44 }
  0x3b   : > { %1191 = vmatprep.subr.mxu0 %v1388_v1  ;;  %v517_v5 = vld [vmem:[%s1529_s20 + $0x148] sm:$0xff]  ;;  %v593_v8 = vadd.f32 %v592_v59, %v510_v51  ;;  %v677_v9 = vld [vmem:[%s1770_s2 + $0x18] sm:$0xff]  ;;  %v512_v12 = vld [vmem:[%s1529_s20 + $0x120] sm:$0xff]  ;;  %v570_v14 = vadd.f32 %v569_v2, %v497_v56  ;;  %v582_v15 = vadd.f32 %v581_v3, %v504_v57 }
  0x3c   : > { %1192 = vmatpush3.msra.mxu0 %v682_v20  ;;  %v499_v10 = vld [vmem:[%s1529_s20 + $0xb8] sm:$0xff]  ;;  %v506_v11 = vld [vmem:[%s1529_s20 + $0xf0] sm:$0xff]  ;;  %v547_v13 = vrot.slane %v546_v0, 4  ;;  %v605_v16 = vadd.f32 %v517_v5, %v516_v63  ;;  %v524_v18 = vld [vmem:[%s1529_s20 + $0x180] sm:$0xff]  ;;  %v559_v20 = vadd.f32 %v558_v7, %v491_v55 }
  0x3d   : > { %1193 = vmatprep.subr.mxu0 %v1388_v1  ;;  %v519_v17 = vld [vmem:[%s1529_s20 + $0x158] sm:$0xff]  ;;  %v525_v19 = vld [vmem:[%s1529_s20 + $0x188] sm:$0xff]  ;;  %v594_v21 = vadd.f32 %v593_v8, %v511_v62  ;;  %v526_v25 = vld [vmem:[%s1529_s20 + $0x190] sm:$0xff]  ;;  %v571_v27 = vadd.f32 %v570_v14, %v498_v61 }
  0x3e   : > { %1194 = vmatpush3.msra.mxu0 %v681_v28  ;;  %v676_v22 = vld [vmem:[%s1770_s2 + $0x10] sm:$0xff]  ;;  %v507_v23 = vld [vmem:[%s1529_s20 + $0xf8] sm:$0xff]  ;;  %v548_v26 = vadd.f32 %v547_v13, %v546_v0  ;;  %v583_v28 = vadd.f32 %v582_v15, %v505_v4  ;;  %v606_v29 = vadd.f32 %v605_v16, %v518_v6  ;;  %v520_v31 = vld [vmem:[%s1529_s20 + $0x160] sm:$0xff]  ;;  %v560_v33 = vrot.slane %v559_v20, 4 }
  0x3f   : > { %1195 = vmatprep.subr.mxu0 %v1388_v1  ;;  %v513_v24 = vld [vmem:[%s1529_s20 + $0x128] sm:$0xff]  ;;  %v514_v30 = vld [vmem:[%s1529_s20 + $0x130] sm:$0xff]  ;;  %v527_v32 = vld [vmem:[%s1529_s20 + $0x198] sm:$0xff]  ;;  %v595_v34 = vadd.f32 %v594_v21, %v512_v12  ;;  %v618_v35 = vadd.f32 %v525_v19, %v524_v18  ;;  %v572_v40 = vadd.f32 %v571_v27, %v499_v10 }
  0x40   : > { %1196 = vmatpush3.msra.mxu0 %v680_v37  ;;  %v532_v36 = vld [vmem:[%s1529_s20 + $0x1c0] sm:$0xff]  ;;  %v533_v37 = vld [vmem:[%s1529_s20 + $0x1c8] sm:$0xff]  ;;  %v534_v38 = vld [vmem:[%s1529_s20 + $0x1d0] sm:$0xff]  ;;  %v549_v39 = vrot.slane %v548_v26, 2  ;;  %v584_v41 = vadd.f32 %v583_v28, %v506_v11  ;;  %v607_v42 = vadd.f32 %v606_v29, %v519_v17  ;;  %v561_v46 = vadd.f32 %v560_v33, %v559_v20 }
  0x41   : > { %1197 = vmatprep.subr.mxu0 %v1388_v1  ;;  %v675_v43 = vld [vmem:[%s1770_s2 + $0x8] sm:$0xff]  ;;  %v515_v44 = vld [vmem:[%s1529_s20 + $0x138] sm:$0xff]  ;;  %v596_v47 = vadd.f32 %v595_v34, %v513_v24  ;;  %v631_v49 = vadd.f32 %v533_v37, %v532_v36  ;;  %v573_v53 = vrot.slane %v572_v40, 4  ;;  %v522_v57 = vld [vmem:[%s1529_s20 + $0x170] sm:$0xff] }
  0x42   : > { %1198 = vmatpush3.msra.mxu0 %v679_v48  ;;  %v521_v45 = vld [vmem:[%s1529_s20 + $0x168] sm:$0xff]  ;;  %v619_v48 = vadd.f32 %v618_v35, %v526_v25  ;;  %v528_v50 = vld [vmem:[%s1529_s20 + $0x1a0] sm:$0xff]  ;;  %v535_v51 = vld [vmem:[%s1529_s20 + $0x1d8] sm:$0xff]  ;;  %v550_v52 = vadd.f32 %v549_v39, %v548_v26  ;;  %v585_v54 = vadd.f32 %v584_v41, %v507_v23  ;;  %v608_v55 = vadd.f32 %v607_v42, %v520_v31 }
  0x43   : > { %1199 = vmatprep.subr.mxu0 %v1388_v1  ;;  %v775_v56 = vld [vmem:[%s1772_s4 + $0x38] sm:$0xff]  ;;  %v562_v58 = vrot.slane %v561_v46, 2  ;;  %v597_v59 = vadd.f32 %v596_v47, %v514_v30  ;;  %v632_v61 = vadd.f32 %v631_v49, %v534_v38  ;;  %v774_v62 = vld [vmem:[%s1772_s4 + $0x30] sm:$0xff]  ;;  %v674_v63 = vld [vmem:[%s1770_s2] sm:$0xff]  ;;  %v574_v4 = vadd.f32 %v573_v53, %v572_v40 }
  0x44   : > { %1200 = vmatpush3.msra.mxu0 %v678_v60  ;;  %v620_v60 = vadd.f32 %v619_v48, %v527_v32  ;;  %1213 = vmatpush3.msra.mxu1 %v775_v56  ;;  %v529_v0 = vld [vmem:[%s1529_s20 + $0x1a8] sm:$0xff]  ;;  %v536_v2 = vld [vmem:[%s1529_s20 + $0x1e0] sm:$0xff]  ;;  %v551_v3 = vrot.slane %v550_v52, 1  ;;  %v586_v5 = vrot.slane %v585_v54, 4  ;;  %v609_v6 = vadd.f32 %v608_v55, %v521_v45  ;;  %v523_v7 = vld [vmem:[%s1529_s20 + $0x178] sm:$0xff] }
  0x45   : > { %1201 = vmatprep.subr.mxu0 %v1388_v1  ;;  %1214 = vmatprep.subr.mxu1 %v1388_v1  ;;  %v563_v8 = vadd.f32 %v562_v58, %v561_v46  ;;  %v633_v11 = vadd.f32 %v632_v61, %v535_v51  ;;  %v773_v12 = vld [vmem:[%s1772_s4 + $0x28] sm:$0xff]  ;;  %v530_v13 = vld [vmem:[%s1529_s20 + $0x1b0] sm:$0xff]  ;;  %v575_v16 = vrot.slane %v574_v4, 2  ;;  %v772_v23 = vld [vmem:[%s1772_s4 + $0x20] sm:$0xff] }
  0x46   : > { %1202 = vmatpush3.msra.mxu0 %v677_v9  ;;  %v598_v9 = vadd.f32 %v597_v59, %v515_v44  ;;  %v621_v10 = vadd.f32 %v620_v60, %v528_v50  ;;  %v537_v14 = vld [vmem:[%s1529_s20 + $0x1e8] sm:$0xff]  ;;  %v552_v15 = vadd.f32 %v551_v3, %v550_v52  ;;  %v587_v17 = vadd.f32 %v586_v5, %v585_v54  ;;  %v531_v24 = vld [vmem:[%s1529_s20 + $0x1b8] sm:$0xff]  ;;  %v538_v25 = vld [vmem:[%s1529_s20 + $0x1f0] sm:$0xff] }
  0x47   : > { %1203 = vmatprep.subr.mxu0 %v1388_v1  ;;  %v610_v18 = vadd.f32 %v609_v6, %v522_v57  ;;  %1215 = vmatpush3.msra.mxu1 %v774_v62  ;;  %v564_v19 = vrot.slane %v563_v8, 1  ;;  %v576_v26 = vadd.f32 %v575_v16, %v574_v4  ;;  %v771_v33 = vld [vmem:[%s1772_s4 + $0x18] sm:$0xff] }
  0x48   : > { %1204 = vmatpush3.msra.mxu0 %v676_v22  ;;  %v599_v20 = vrot.slane %v598_v9, 4  ;;  %v622_v21 = vadd.f32 %v621_v10, %v529_v0  ;;  %v634_v22 = vadd.f32 %v633_v11, %v536_v2  ;;  %1216 = vmatprep.subr.mxu1 %v1388_v1  ;;  %v588_v27 = vrot.slane %v587_v17, 2  ;;  %v539_v34 = vld [vmem:[%s1529_s20 + $0x1f8] sm:$0xff]  ;;  %v770_v10 = vld [vmem:[%s1772_s4 + $0x10] sm:$0xff]  ;;  %v769_v11 = vld [vmem:[%s1772_s4 + $0x8] sm:$0xff]  ;;  %s469_s20 = scalar_lea.vmem %s1789_s29, %s1133_s23 }
  0x49   : > { %1205 = vmatprep.subr.mxu0 %v1388_v1  ;;  %v611_v28 = vadd.f32 %v610_v18, %v523_v7  ;;  %1217 = vmatpush3.msra.mxu1 %v773_v12  ;;  %v565_v29 = vadd.f32 %v564_v19, %v563_v8  ;;  %v577_v35 = vrot.slane %v576_v26, 1  ;;  %v768_v12 = vld [vmem:[%s1772_s4] sm:$0xff]  ;;  %v858_v18 = vlaneseq }
  0x4a   : > { %1206 = vmatpush3.msra.mxu0 %v675_v43  ;;  %v600_v30 = vadd.f32 %v599_v20, %v598_v9  ;;  %v623_v31 = vadd.f32 %v622_v21, %v530_v13  ;;  %v635_v32 = vadd.f32 %v634_v22, %v537_v14  ;;  %1218 = vmatprep.subr.mxu1 %v1388_v1  ;;  %v1135_v13 = vld [vmem:[%s1771_s3] ss:$0 sm:$0xff] }
  0x4b   : > { %1207 = vmatprep.subr.mxu0 %v1388_v1  ;;  %v589_v36 = vadd.f32 %v588_v27, %v587_v17  ;;  %v612_v37 = vrot.slane %v611_v28, 4  ;;  %1219 = vmatpush3.msra.mxu1 %v772_v23  ;;  %v653_v41 = vsel %vm652_vm1, %v565_v29, %v552_v15  ;;  %v578_v42 = vadd.f32 %v577_v35, %v576_v26  ;;  %v857_v22 = vld [vmem:[%s1774_s6] sm:$0xf] }
  0x4c   : > { %1208 = vmatpush3.msra.mxu0 %v674_v63  ;;  %v601_v38 = vrot.slane %v600_v30, 2  ;;  %v624_v39 = vadd.f32 %v623_v31, %v531_v24  ;;  %v636_v40 = vadd.f32 %v635_v32, %v538_v25  ;;  %1220 = vmatprep.subr.mxu1 %v1388_v1  ;;  %v859_v19 = vshrl.u32 %v858_v18, 7  ;;  %v1136_v25 = vld [vmem:[%s1773_s5] ss:$0 sm:$0xff] }
  0x4d   : > { %v590_v43 = vrot.slane %v589_v36, 1  ;;  %v613_v44 = vadd.f32 %v612_v37, %v611_v28  ;;  %1221 = vmatpush3.msra.mxu1 %v771_v33  ;;  %v655_v50 = vsel %vm654_vm2, %v578_v42, %v653_v41 }
  0x4e   : > { %v602_v45 = vadd.f32 %v601_v38, %v600_v30  ;;  %v625_v46 = vrot.slane %v624_v39, 4  ;;  %v637_v47 = vadd.f32 %v636_v40, %v539_v34  ;;  %1222 = vmatprep.subr.mxu1 %v1388_v1  ;;  %v877_v20 = vsub.s32 2, %v859_v19 }
  0x4f   : > { %v591_v48 = vadd.f32 %v590_v43, %v589_v36  ;;  %v614_v49 = vrot.slane %v613_v44, 2  ;;  %1223 = vmatpush3.msra.mxu1 %v770_v10  ;;  %v860_v21 = vsub.s32 0, %v859_v19  ;;  %v885_v23 = vsub.s32 3, %v859_v19 }
  0x50   : > { %v603_v51 = vrot.slane %v602_v45, 1  ;;  %v626_v52 = vadd.f32 %v625_v46, %v624_v39  ;;  %v638_v53 = vrot.slane %v637_v47, 4  ;;  %1224 = vmatprep.subr.mxu1 %v1388_v1  ;;  %v869_v24 = vsub.s32 1, %v859_v19 }
  0x51   : > { %v615_v54 = vadd.f32 %v614_v49, %v613_v44  ;;  %v657_v55 = vsel %vm656_vm3, %v591_v48, %v655_v50  ;;  %1225 = vmatpush3.msra.mxu1 %v769_v11  ;;  %v878_v26 = vrot.slane %v857_v22, %v877_v20  ;;  %v861_v27 = vrot.slane %v857_v22, %v860_v21  ;;  %v1139_v50 = vld [vmem:[%s1776_s8] ss:$0 sm:$0xff] }
  0x52   : > { %v604_v56 = vadd.f32 %v603_v51, %v602_v45  ;;  %v627_v57 = vrot.slane %v626_v52, 2  ;;  %v639_v58 = vadd.f32 %v638_v53, %v637_v47  ;;  %1226 = vmatprep.subr.mxu1 %v1388_v1  ;;  %v886_v30 = vrot.slane %v857_v22, %v885_v23  ;;  %v1138_v45 = vld [vmem:[%s1775_s7] ss:$0 sm:$0xff] }
  0x53   : > { %v616_v59 = vrot.slane %v615_v54, 1  ;;  %1227 = vmatpush3.msra.mxu1 %v768_v12  ;;  %v870_v31 = vrot.slane %v857_v22, %v869_v24 }
  0x54   : > { %v628_v60 = vadd.f32 %v627_v57, %v626_v52  ;;  %v640_v61 = vrot.slane %v639_v58, 2  ;;  %v659_v62 = vsel %vm658_vm4, %v604_v56, %v657_v55  ;;  %1231 = vmatprep.subr.mxu1 %v1388_v1  ;;  %v1140_v55 = vld [vmem:[#allocation3] ss:$0 sm:$0xff] }
  0x55   : > { %v617_v63 = vadd.f32 %v616_v59, %v615_v54  ;;  %v1390_v54 = vmov 0  }
  0x56   : > { %v629_v0 = vrot.slane %v628_v60, 1  ;;  %v641_v2 = vadd.f32 %v640_v61, %v639_v58  ;;  %1300 = vset.pattern.permute.xlu0 %v1390_v54  ;;  %1299 = vset.pattern.permute.xlu1 %v1390_v54 }
  0x57   : > { %v661_v3 = vsel %vm660_vm5, %v617_v63, %v659_v62  ;;  %v952_v63 = vld [vmem:[%s1778_s10 + $0x8] sm:$0xff] }
  0x58   : > { %v630_v4 = vadd.f32 %v629_v0, %v628_v60  ;;  %v642_v5 = vrot.slane %v641_v2, 1  ;;  %v951_v0 = vld [vmem:[%s1778_s10] sm:$0xff] }
  0x5a   : > { %v643_v6 = vadd.f32 %v642_v5, %v641_v2  ;;  %v663_v7 = vsel %vm662_vm6, %v630_v4, %v661_v3  ;;  %v939_v2 = vld [vmem:[%s465_s14] sm:$0xff] }
  0x5c   : > { %v665_v8 = vsel %vm664_vm7, %v643_v6, %v663_v7 }
  0x5d   : > { %v673_v9 = vmul.f32 0.015625, %v665_v8  ;;  %v1142_v8 = vld [vmem:[%s1788_s26] ss:$0 sm:$0xff] }
  0x5f   : > { %1210 = vmatmul.mubr.f32.vlgmr.msra.gmra.mxu0 %v673_v9 }
 0x11f   : > { %v763_v14 = vpop.f32.mrf.mxu0 }
 0x120   : > { %v764_v15 = vadd.f32 %v1135_v13, %v763_v14 }
 0x121   : > { %v1211_v16 = vpop.f32.mrf.mxu0 }
 0x122   : > { %v767_v17 = vmax.f32 %v764_v15, 0.0 }
 0x124   : > { %1229 = vmatmul.mubr.msk.f32.vlgmr.msra.gmra.mxu1 %vm783_vm8, %v767_v17 }
 0x125   : > { %1235 = vmatprep.mubr.msk.f32.mxu1 %vm1389_vm0, %v1388_v1  ;;  %1232 = vmatpush3.msra.mxu1 %v952_v63 }
 0x126   : > { %1233 = vmatprep.subr.mxu1 %v1388_v1 }
 0x127   : > { %1234 = vmatpush3.msra.mxu1 %v951_v0 }
 0x1e4   : > { %v853_v28 = vpop.f32.mrf.mxu1 }
 0x1e5   : > { %v1713_v29 = vadd.f32 %v1136_v25, %v853_v28 }
 0x1e6   : > { %v1230_v32 = vpop.f32.mrf.mxu1 }
 0x1e7   : > { %v879_v33 = vmul.f32 %v878_v26, %v1713_v29  ;;  %v862_v34 = vmul.f32 %v861_v27, %v1713_v29  ;;  %v887_v37 = vmul.f32 %v886_v30, %v1713_v29  ;;  %v871_v38 = vmul.f32 %v870_v31, %v1713_v29 }
 0x1e9   : > { %v880_v35 = vsel %vm863_vm9, %v879_v33, 0.0  ;;  %v864_v36 = vsel %vm863_vm9, %v862_v34, 0.0  ;;  %v888_v39 = vsel %vm863_vm9, %v887_v37, 0.0  ;;  %v872_v40 = vsel %vm863_vm9, %v871_v38, 0.0 }
 0x1ea   : > { %881 = vadd.xlane.f32.xlu1 %v880_v35  ;;  %865 = vadd.xlane.f32.xlu0 %v864_v36 }
 0x1ee   : > { %889 = vadd.xlane.f32.xlu1 %v888_v39  ;;  %873 = vadd.xlane.f32.xlu0 %v872_v40 }
 0x273   : > { %v882_v41 = vpop.xlane.xlu1 %881  ;;  %v866_v42 = vpop.xlane.xlu0 %865 }
 0x277   : > { %v874_v43 = vpop.xlane.xlu0 %873  ;;  %v890_v46 = vpop.xlane.xlu1 %889 }
 0x278   : > { %v892_v44 = vsel %vm891_vm10, %v866_v42, %v874_v43 }
 0x279   : > { %v894_v47 = vsel %vm893_vm11, %v892_v44, %v882_v41 }
 0x27a   : > { %v896_v48 = vsel %vm895_vm12, %v894_v47, %v890_v46 }
 0x27b   : > { %v904_v49 = vadd.f32 %v1138_v45, %v896_v48 }
 0x27d   : > { %v905_v51 = vmax.f32 %v904_v49, 0.0 }
 0x27f   : > { %v913_v52 = vmul.f32 %v1139_v50, %v905_v51 }
 0x281   : > { %v915_v53 = vsel %vm914_vm13, %v913_v52, 0.0 }
 0x282   : > { %916 = vadd.xlane.f32.xlu0 %v915_v53 }
 0x30b   : > { %v917_v56 = vpop.xlane.xlu0 %916 }
 0x30c   : > { %v925_v57 = vadd.f32 %v1140_v55, %v917_v56 }
 0x30e   : > { %v1141_v58 = vmul.f32 -1.442695, %v925_v57 }
 0x310   : > { %1301 = vpow2.f32 %v1141_v58 }
 0x31d   : > { %v1302_v59 = vpop.eup %1301 }
 0x31e   : > { %v929_v60 = vadd.f32 1.0, %v1302_v59 }
 0x320   : > { %1303 = vrcp.f32 %v929_v60 }
 0x32d   : > { %v1304_v61 = vpop.eup %1303 }
 0x32e   : > { %934 = vperm.xlu0 %1300, %v1304_v61   ;;  %v938_v62 = vsub.f32 1.0, %v1304_v61 }
 0x330   : > { %942 = vperm.xlu1 %1299, %v938_v62  }
 0x3a9   : > { %v935_v5 = vpop.permute.xlu0 %934 }
 0x3aa   : > { %v937_v6 = vmul.f32 %v935_v5, %v1713_v29 }
 0x3ab   : > { %v943_v3 = vpop.permute.xlu1 %942 }
 0x3ac   : > { %v945_v4 = vmul.f32 %v943_v3, %v939_v2 }
 0x3ae   : > { %947 = vrot.lane.b32.xlu1 %v945_v4, %s1391_s18 }
 0x420   : > { %v948_v7 = vpop.permute.xlu1 %947 }
 0x421   : > { %v950_v1 = vsel %vm863_vm9, %v937_v6, %v948_v7 }
 0x422   : > { %1236 = vmatmul.mubr.msk.f32.vlgmr.msra.gmra.mxu1 %vm960_vm14, %v950_v1 }
 0x4e2   : > { %v1030_v9 = vpop.f32.mrf.mxu1 }
 0x4e3   : > { %v1031_v10 = vadd.f32 %v1142_v8, %v1030_v9 }
 0x4e4   : > { %v1237_v11 = vpop.f32.mrf.mxu1 }
 0x4e5   : > { %1034 = vst.msk [vmem:[%s469_s20] sm:$0xff] %vm863_vm9, %v1031_v10 }
 0x4e6 PF: > { %s27_s28 = sadd.s32 1, %s1383_s28   ;;  %s1790_s11 = sld [smem:[#allocation7_spill]] }
 0x4e7   : > { %p24_p8 = scmp.ge.s32.totalorder %s27_s28, 4   ;;  %s1791_s23 = smov %s1367_s24 }
 0x4e8   : > { %s1792_s24 = smov %s1371_s25  ;;  %s1793_s25 = smov %s1509_s16 }
 0x4e9   : > { %s1794_s26 = smov %s1379_s27  ;;  %26 = sbr.rel (!%p24_p8) target bundleno = 7 (0x7), region = 119 }
 0x4ec   : > { %s1795_s27 = smov %s1790_s11 }
 0x4ee   :  { %1054 = vsyncpa [#allocation5], 1 }
 0x4ef   :  { %1056 = vsyncpa [#allocation5 + $0x1], 1 }

</bundles_post_ra>
